<compile_context>
chip_gen: v6e
topology: v6e:2x2x1
jax: 0.10.0
libtpu: 0.0.40
codegen_flags: <defaults>
</compile_context>

<pallas_src>
import functools

import jax
import jax.numpy as jnp
from jax.experimental import pallas as pl
from jax.experimental.pallas import tpu as pltpu

EPS = 1e-5  # PyTorch nn.LayerNorm default


def _add_norm_kernel(x_ref, sub_ref, gamma_ref, beta_ref, o_ref):
    # x_ref/sub_ref/o_ref: (row_tile, D) tiles; gamma/beta: (1, D) f32
    # (cast once in the wrapper, so no per-tile cast here).
    s = sub_ref[...].astype(jnp.float32)

    # Two-pass mean / variance (sum, then sum of centered squares).  The
    # E[s^2]-E[s]^2 form loses bits when |mean| >> std (common for transformer
    # residual activations); the kernel is HBM-bound, so the extra cross-lane
    # reduction is hidden under the DMA anyway.
    mean = jnp.mean(s, axis=-1, keepdims=True)
    centered = s - mean
    var = jnp.mean(centered * centered, axis=-1, keepdims=True)

    y = centered * jax.lax.rsqrt(var + EPS) * gamma_ref[...] + beta_ref[...]

    # Residual add in f32, single rounding to the output dtype.
    o_ref[...] = (x_ref[...].astype(jnp.float32) + y).astype(o_ref.dtype)


def _vmem_limit_bytes():
    """Per-generation scoped-VMEM limit.

    ~96 MiB on v5e/v6e (128 MiB physical per TC), ~48 MiB on v7x
    (64 MiB physical per TC, both TCs used via the parallel row axis).
    """
    try:
        cap = pltpu.get_tpu_info().vmem_capacity_bytes
    except Exception:
        cap = 64 * 1024 * 1024  # conservative (v7x-sized) fallback
    if cap >= 128 * 1024 * 1024:
        return 96 * 1024 * 1024
    return 48 * 1024 * 1024


def _pick_row_tile(num_rows, d, itemsize, vmem_limit):
    """Largest power-of-two row tile fitting ~80% of the scoped-VMEM limit.

    Per-row cost: 3 streamed arrays (x, sublayer, out), each double-buffered
    (6 * itemsize bytes), plus ~3 f32-sized temporaries live in the kernel
    body (3 * 4 bytes).  Targets multi-MiB per-stream blocks so the ~0.35 us
    per-grid-step pipeline overhead is amortized.
    """
    budget = int(0.8 * vmem_limit)
    per_row_bytes = d * (6 * itemsize + 3 * 4)
    max_rows = max(budget // per_row_bytes, 1)
    tile = 1 << (max_rows.bit_length() - 1)  # largest power of two <= max_rows

    # Sub-32-bit dtypes pack 2/4 rows per sublane: keep full packed sublanes
    # (8 rows f32, 16 rows bf16, 32 rows int8/fp8).
    min_tile = max(8, 32 // itemsize)

    # Don't blow tiny inputs up into one huge, mostly-empty block.
    while tile > min_tile and tile >= 2 * num_rows:
        tile //= 2
    return max(tile, min_tile)


@functools.partial(jax.jit, static_argnames=("row_tile", "vmem_limit"))
def _add_norm_impl(x2, s2, g2, b2, *, row_tile, vmem_limit):
    R, D = x2.shape
    # cdiv grid: the partial last block (when R % row_tile != 0) is clipped by
    # Pallas — garbage rows in the padded part never contaminate valid rows
    # (LayerNorm is strictly per-row) and their outputs are never written.
    grid = (pl.cdiv(R, row_tile),)
    return pl.pallas_call(
        _add_norm_kernel,
        out_shape=jax.ShapeDtypeStruct((R, D), x2.dtype),
        grid_spec=pltpu.PrefetchScalarGridSpec(
            num_scalar_prefetch=0,
            grid=grid,
            in_specs=[
                pl.BlockSpec((row_tile, D), lambda i: (i, 0)),  # x
                pl.BlockSpec((row_tile, D), lambda i: (i, 0)),  # sublayer
                pl.BlockSpec((1, D), lambda i: (0, 0)),         # gamma (f32)
                pl.BlockSpec((1, D), lambda i: (0, 0)),         # beta  (f32)
            ],
            out_specs=pl.BlockSpec((row_tile, D), lambda i: (i, 0)),
        ),
        compiler_params=pltpu.CompilerParams(
            # Row axis is embarrassingly parallel -> shards across TensorCores
            # where there are two (v7x); harmless elsewhere.
            dimension_semantics=("parallel",),
            # Keep default double buffering (kernel is DMA-bound; deeper
            # pipelining would only shrink the block size).
            vmem_limit_bytes=vmem_limit,
        ),
    )(x2, s2, g2, b2)


def add_norm(x, sublayer, gamma, beta):
    """x, sublayer: (B, S, D); gamma, beta: (D,). Returns x + LayerNorm(sublayer)."""
    B, S, D = x.shape
    R = B * S
    itemsize = jnp.dtype(x.dtype).itemsize

    vmem_limit = _vmem_limit_bytes()
    row_tile = _pick_row_tile(R, D, itemsize, vmem_limit)

    # NOTE: for production shapes keep D a multiple of 128 (lane-dense stores);
    # small d_model (e.g. the toy test's D=32) pays a masked-store penalty.
    x2 = x.reshape(R, D)
    s2 = sublayer.reshape(R, D)
    # Cast the tiny affine params to f32 once here instead of per tile.
    g2 = gamma.reshape(1, D).astype(jnp.float32)
    b2 = beta.reshape(1, D).astype(jnp.float32)

    out = _add_norm_impl(x2, s2, g2, b2, row_tile=row_tile, vmem_limit=vmem_limit)
    return out.reshape(B, S, D)


def _reference(x, sublayer, gamma, beta):
    mean = jnp.mean(sublayer, axis=-1, keepdims=True)
    var = jnp.mean((sublayer - mean) ** 2, axis=-1, keepdims=True)
    return x + (sublayer - mean) / jnp.sqrt(var + EPS) * gamma + beta


if __name__ == "__main__":
    key = jax.random.PRNGKey(0)

    # Case 1: even row count (B=2, S=8, D=32).
    # Case 2: ragged row count (B=3, S=5 -> R=15) exercising the clipped
    #         partial last block (no jnp.pad / output slice round-trips).
    for (B, S, D) in [(2, 8, 32), (3, 5, 32)]:
        kx, ks, key = jax.random.split(key, 3)
        x = jax.random.normal(kx, (B, S, D), dtype=jnp.float32)
        sublayer = jax.random.normal(ks, (B, S, D), dtype=jnp.float32)

        # PyTorch LayerNorm default init: weight=1, bias=0.
        gamma = jnp.ones((D,), dtype=jnp.float32)
        beta = jnp.zeros((D,), dtype=jnp.float32)

        out = add_norm(x, sublayer, gamma, beta)
        jax.block_until_ready(out)

        ref = _reference(x, sublayer, gamma, beta)
        assert out.shape == (B, S, D)
        assert jnp.allclose(out, ref, atol=1e-4, rtol=1e-4), \
            f"mismatch vs reference for shape {(B, S, D)}"

    print("KERNEL_OK")
</pallas_src>

<mosaic_0001>
module attributes {stable_mosaic.version = 11 : i64} {
  func.func @_add_norm_kernel(%arg0: i32, %arg1: memref<16x32xf32, #tpu.memory_space<vmem>>, %arg2: memref<16x32xf32, #tpu.memory_space<vmem>>, %arg3: memref<1x32xf32, #tpu.memory_space<vmem>>, %arg4: memref<1x32xf32, #tpu.memory_space<vmem>>, %arg5: memref<16x32xf32, #tpu.memory_space<vmem>>) attributes {dimension_semantics = [#tpu.dimension_semantics<parallel>], iteration_bounds = array<i64: 1>, scalar_prefetch = 0 : i64, scratch_operands = 0 : i64, tpu.core_type = #tpu.core_type<tc>, window_params = [{transform_indices = @transform_0, window_bounds = array<i64: 16, 32>}, {transform_indices = @transform_1, window_bounds = array<i64: 16, 32>}, {pipeline_mode = #tpu.pipeline_mode<synchronous>, transform_indices = @transform_2, window_bounds = array<i64: 1, 32>}, {pipeline_mode = #tpu.pipeline_mode<synchronous>, transform_indices = @transform_3, window_bounds = array<i64: 1, 32>}, {transform_indices = @transform_4, window_bounds = array<i64: 16, 32>}]} {
    %c0 = arith.constant 0 : index
    %c0_0 = arith.constant 0 : index
    %0 = vector.load %arg2[%c0, %c0_0] : memref<16x32xf32, #tpu.memory_space<vmem>>, vector<16x32xf32>
    %cst = arith.constant dense<0.000000e+00> : vector<16xf32>
    %1 = vector.multi_reduction <add>, %0, %cst [1] : vector<16x32xf32> to vector<16xf32>
    %2 = vector.shape_cast %1 : vector<16xf32> to vector<16x1xf32>
    %cst_1 = arith.constant 3.200000e+01 : f32
    %3 = vector.broadcast %cst_1 : f32 to vector<16x1xf32>
    %4 = arith.divf %2, %3 : vector<16x1xf32>
    %5 = vector.broadcast %4 : vector<16x1xf32> to vector<16x32xf32>
    %6 = arith.subf %0, %5 : vector<16x32xf32>
    %7 = arith.mulf %6, %6 : vector<16x32xf32>
    %cst_2 = arith.constant dense<0.000000e+00> : vector<16xf32>
    %8 = vector.multi_reduction <add>, %7, %cst_2 [1] : vector<16x32xf32> to vector<16xf32>
    %9 = vector.shape_cast %8 : vector<16xf32> to vector<16x1xf32>
    %cst_3 = arith.constant 3.200000e+01 : f32
    %10 = vector.broadcast %cst_3 : f32 to vector<16x1xf32>
    %11 = arith.divf %9, %10 : vector<16x1xf32>
    %cst_4 = arith.constant 9.99999974E-6 : f32
    %12 = vector.broadcast %cst_4 : f32 to vector<16x1xf32>
    %13 = arith.addf %11, %12 : vector<16x1xf32>
    %14 = math.rsqrt %13 : vector<16x1xf32>
    %15 = vector.broadcast %14 : vector<16x1xf32> to vector<16x32xf32>
    %16 = arith.mulf %6, %15 : vector<16x32xf32>
    %c0_5 = arith.constant 0 : index
    %c0_6 = arith.constant 0 : index
    %17 = vector.load %arg3[%c0_5, %c0_6] : memref<1x32xf32, #tpu.memory_space<vmem>>, vector<1x32xf32>
    %18 = vector.broadcast %17 : vector<1x32xf32> to vector<16x32xf32>
    %19 = arith.mulf %16, %18 : vector<16x32xf32>
    %c0_7 = arith.constant 0 : index
    %c0_8 = arith.constant 0 : index
    %20 = vector.load %arg4[%c0_7, %c0_8] : memref<1x32xf32, #tpu.memory_space<vmem>>, vector<1x32xf32>
    %21 = vector.broadcast %20 : vector<1x32xf32> to vector<16x32xf32>
    %22 = arith.addf %19, %21 : vector<16x32xf32>
    %c0_9 = arith.constant 0 : index
    %c0_10 = arith.constant 0 : index
    %23 = vector.load %arg1[%c0_9, %c0_10] : memref<16x32xf32, #tpu.memory_space<vmem>>, vector<16x32xf32>
    %24 = arith.addf %23, %22 : vector<16x32xf32>
    %c0_11 = arith.constant 0 : index
    %c0_12 = arith.constant 0 : index
    %25 = vector.load %arg5[%c0_11, %c0_12] : memref<16x32xf32, #tpu.memory_space<vmem>>, vector<16x32xf32>
    tpu.vector_store %arg5[%c0_11, %c0_12], %24 {strides = array<i32>} : memref<16x32xf32, #tpu.memory_space<vmem>>, vector<16x32xf32>,
    return
  }
  func.func @transform_0(%arg0: i32) -> (i32, i32) {
    %c0_i32 = arith.constant 0 : i32
    %c0_i32_0 = arith.constant 0 : i32
    return %arg0, %c0_i32 : i32, i32
  }
  func.func @transform_1(%arg0: i32) -> (i32, i32) {
    %c0_i32 = arith.constant 0 : i32
    %c0_i32_0 = arith.constant 0 : i32
    return %arg0, %c0_i32 : i32, i32
  }
  func.func @transform_2(%arg0: i32) -> (i32, i32) {
    %c0_i32 = arith.constant 0 : i32
    %c0_i32_0 = arith.constant 0 : i32
    %c0_i32_1 = arith.constant 0 : i32
    return %c0_i32, %c0_i32_0 : i32, i32
  }
  func.func @transform_3(%arg0: i32) -> (i32, i32) {
    %c0_i32 = arith.constant 0 : i32
    %c0_i32_0 = arith.constant 0 : i32
    %c0_i32_1 = arith.constant 0 : i32
    return %c0_i32, %c0_i32_0 : i32, i32
  }
  func.func @transform_4(%arg0: i32) -> (i32, i32) {
    %c0_i32 = arith.constant 0 : i32
    %c0_i32_0 = arith.constant 0 : i32
    return %arg0, %c0_i32 : i32, i32
  }
}

</mosaic_0001>

<bundles_post_ra>
// kernel: _add_norm_impl.1
= control target key start
LH: loop header
LB: loop body
LE: loop exit
PB: predicated region body
PF: predicated region fallthrough
CT: control target
= control target key end

     0   :  { %9 = vsyncpa [#allocation3], 0  ;;  %s255_s0 = inlined_call_operand.hbm [shape: f32[16,32], index: 0, kind: input, shape index: {}]   ;;  %s256_s1 = inlined_call_operand.hbm [shape: f32[16,32], index: 1, kind: input, shape index: {}]   ;;  %s257_s2 = inlined_call_operand.vmem [shape: f32[1,32], index: 2, kind: input, shape index: {}]   ;;  %s258_s3 = inlined_call_operand.vmem [shape: f32[1,32], index: 3, kind: input, shape index: {}]   ;;  %s259_s4 = inlined_call_operand.hbm [shape: f32[16,32], index: 4, kind: output, shape index: {}]  }
   0x1   :  { %10 = vsyncpa [#allocation6], 0 }
   0x2   :  { %11 = vsyncpa [#allocation4], 0  ;;  %s195_s15 = smov [#allocation2]  }
   0x3   :  { %s17_s16 = sshll.u32 %s195_s15, 4  ;;  %s18_s16 = int_to_ptr.vmem [resolvable:$true] %s17_s16 }
   0x4   :  { %s137_s17 = scalar_lea.vmem %s18_s16, 256  ;;  %p142_p1 = scmp.lt.s32.totalorder %s18_s16, %s18_s16 }
   0x5   :  { %p138_p0 = scmp.ne.s32.totalorder %s18_s16, %s137_s17  ;;  %p143_p2 = scmp.lt.s32.totalorder %s137_s17, %s137_s17 }
   0x7   :  { %p144_p3 = por %p143_p2, %p142_p1 }
   0x9   :  { %p145_p4 = pnand %p144_p3, %p138_p0 }
   0xb   :  { %148 = shalt.err (!%p145_p4)
}
   0xc   :  { %s196_s18 = smov 128   ;;  %s197_s19 = smov 8  }
   0xd   :  { %23 = dma.hbm_to_vmem [thread:$0]  %s255_s0, 256, %s18_s16, [#allocation3], %s196_s18, %s196_s18, %s197_s19  }
   0xe   :  { %s198_s22 = smov [#allocation5]  }
   0xf   :  { %s29_s23 = sshll.u32 %s198_s22, 4  ;;  %s30_s23 = int_to_ptr.vmem [resolvable:$true] %s29_s23 }
  0x10   :  { %s157_s24 = scalar_lea.vmem %s30_s23, 256  ;;  %p162_p6 = scmp.lt.s32.totalorder %s30_s23, %s30_s23 }
  0x11   :  { %p158_p5 = scmp.ne.s32.totalorder %s30_s23, %s157_s24  ;;  %p163_p7 = scmp.lt.s32.totalorder %s157_s24, %s157_s24 }
  0x13   :  { %p164_p8 = por %p163_p7, %p162_p6 }
  0x15   :  { %p165_p9 = pnand %p164_p8, %p158_p5 }
  0x17   :  { %168 = shalt.err (!%p165_p9)
}
  0x18   :  { %35 = dma.hbm_to_vmem [thread:$0]  %s256_s1, 256, %s30_s23, [#allocation6], %s196_s18, %s196_s18, %s197_s19  }
  0x19   :  { %189 = dma.done.wait [#allocation3], 256  }
  0x1a   :  { %190 = vsyncadd [#allocation3], 4294967040 }
  0x1b   :  { %191 = dma.done.wait [#allocation6], 256  }
  0x1c   :  { %192 = vsyncadd [#allocation6], 4294967040  ;;  %vm48_vm0 = vcmask 261120   ;;  %v46_v0 = vld [vmem:[#allocation5] sm:$0xff]  ;;  %v47_v1 = vld [vmem:[#allocation5 + $0x8] sm:$0xff]  ;;  %s199_s29 = smov [#allocation7]  }
  0x1d   :  { %v49_v2 = vsel %vm48_vm0, %v46_v0, 0.0  ;;  %v52_v3 = vsel %vm48_vm0, %v47_v1, 0.0  ;;  %v118_v21 = vld [vmem:[%s257_s2] ss:$0 sm:$0xff]  ;;  %v95_v31 = vld [vmem:[#allocation2 + $0x8] sm:$0xff]  ;;  %s105_s30 = sshll.u32 %s199_s29, 4  ;;  %s106_s30 = int_to_ptr.vmem [resolvable:$true] %s105_s30 }
  0x1e   :  { %50 = vadd.xlane.f32.xlu0 %v49_v2  ;;  %v119_v23 = vld [vmem:[%s258_s3] ss:$0 sm:$0xff]  ;;  %s169_s2 = scalar_lea.vmem %s106_s30, 256  ;;  %p174_p11 = scmp.lt.s32.totalorder %s106_s30, %s106_s30 }
  0x1f   :  { %v94_v26 = vld [vmem:[#allocation2] sm:$0xff]  ;;  %p170_p10 = scmp.ne.s32.totalorder %s106_s30, %s169_s2  ;;  %p175_p12 = scmp.lt.s32.totalorder %s169_s2, %s169_s2 }
  0x21   :  { %p176_p13 = por %p175_p12, %p174_p11 }
  0x22   :  { %53 = vadd.xlane.f32.xlu0 %v52_v3 }
  0x23   :  { %p177_p0 = pnand %p176_p13, %p170_p10 }
  0xa7   :  { %v51_v4 = vpop.xlane.xlu0 %50 }
  0xa8   :  { %v56_v5 = vmul.f32 0.03125, %v51_v4 }
  0xaa   :  { %v58_v6 = vsub.f32 %v46_v0, %v56_v5 }
  0xab   :  { %v54_v7 = vpop.xlane.xlu0 %53 }
  0xac   :  { %v57_v8 = vmul.f32 0.03125, %v54_v7  ;;  %v60_v9 = vmul.f32 %v58_v6, %v58_v6 }
  0xae   :  { %v59_v10 = vsub.f32 %v47_v1, %v57_v8  ;;  %v62_v11 = vsel %vm48_vm0, %v60_v9, 0.0 }
  0xaf   :  { %63 = vadd.xlane.f32.xlu1 %v62_v11 }
  0xb0   :  { %v61_v12 = vmul.f32 %v59_v10, %v59_v10 }
  0xb2   :  { %v65_v13 = vsel %vm48_vm0, %v61_v12, 0.0 }
  0xb3   :  { %66 = vadd.xlane.f32.xlu1 %v65_v13 }
 0x138   :  { %v64_v14 = vpop.xlane.xlu1 %63 }
 0x139   :  { %v68_v15 = vmul.f32 0.03125, %v64_v14 }
 0x13b   :  { %v70_v16 = vadd.f32 1e-05, %v68_v15 }
 0x13c   :  { %v67_v17 = vpop.xlane.xlu1 %66 }
 0x13d   :  { %125 = vrsqrt.f32 %v70_v16  ;;  %v69_v18 = vmul.f32 0.03125, %v67_v17 }
 0x13f   :  { %v71_v19 = vadd.f32 1e-05, %v69_v18 }
 0x141   :  { %127 = vrsqrt.f32 %v71_v19 }
 0x14a   :  { %v126_v20 = vpop.eup %125 }
 0x14b   :  { %v74_v22 = vmul.f32 %v126_v20, %v58_v6 }
 0x14d   :  { %v83_v24 = vmul.f32 %v118_v21, %v74_v22 }
 0x14e   :  { %v128_v25 = vpop.eup %127 }
 0x14f   :  { %v75_v27 = vmul.f32 %v128_v25, %v59_v10  ;;  %v92_v28 = vadd.f32 %v119_v23, %v83_v24 }
 0x151   :  { %v84_v29 = vmul.f32 %v118_v21, %v75_v27  ;;  %v96_v30 = vadd.f32 %v94_v26, %v92_v28 }
 0x153   :  { %v93_v32 = vadd.f32 %v119_v23, %v84_v29  ;;  %98 = vst.msk [vmem:[#allocation7] sm:$0xff] %vm48_vm0, %v96_v30 }
 0x155   :  { %v97_v33 = vadd.f32 %v95_v31, %v93_v32 }
 0x157   :  { %99 = vst.msk [vmem:[#allocation7 + $0x8] sm:$0xff] %vm48_vm0, %v97_v33 }
 0x158   :  { %180 = shalt.err (!%p177_p0)
}
 0x159   :  { %111 = dma.vmem_to_hbm [thread:$0]  %s106_s30, 256, %s259_s4, [#allocation4], %s196_s18, %s196_s18, %s197_s19  }
 0x15a   :  { %193 = dma.done.wait [#allocation4], 256  }
 0x15b   :  { %194 = vsyncadd [#allocation4], 4294967040 }
 0x15c   :  { %115 = vsyncpa [#allocation3], 1 }
 0x15d   :  { %116 = vsyncpa [#allocation6], 1 }
 0x15e   :  { %117 = vsyncpa [#allocation4], 1 }

</bundles_post_ra>
